<compile_context>
chip_gen: v7x
topology: tpu7x:2x2x1
jax: 0.10.0
libtpu: 0.0.40
codegen_flags: <defaults>
</compile_context>

<pallas_src>
import jax
import jax.numpy as jnp
from jax import lax
from jax.experimental import pallas as pl
from jax.experimental.pallas import tpu as pltpu


def _attention_kernel(x_ref, wq_ref, wk_ref, wv_ref, wo_ref, bproj_ref,
                      o_ref, acc_ref):
    h = pl.program_id(1)

    @pl.when(h == 0)
    def _init():
        acc_ref[...] = jnp.zeros_like(acc_ref)

    x = x_ref[0]                                              # (N, C) bf16

    # Per-head projections; softmax scale is already folded into wq.
    q = jnp.dot(x, wq_ref[0], preferred_element_type=jnp.float32)   # (N, hd)
    k = jnp.dot(x, wk_ref[0], preferred_element_type=jnp.float32)   # (N, hd)
    v = jnp.dot(x, wv_ref[0], preferred_element_type=jnp.float32)   # (N, hd)

    # logits = q @ k^T via dot_general (contract last dims, no explicit .T).
    logits = lax.dot_general(
        q.astype(jnp.bfloat16), k.astype(jnp.bfloat16),
        (((1,), (1,)), ((), ())),
        preferred_element_type=jnp.float32)                   # (N, N) f32

    # Softmax in f32 on the VPU; reciprocal on the EUP.
    logits = logits - jnp.max(logits, axis=-1, keepdims=True)
    p = jnp.exp(logits)
    p = p * pl.reciprocal(jnp.sum(p, axis=-1, keepdims=True), approx=True)

    out_h = jnp.dot(p.astype(jnp.bfloat16), v.astype(jnp.bfloat16),
                    preferred_element_type=jnp.float32)       # (N, hd) f32

    # Accumulate this head's contribution to the output projection.
    acc_ref[...] += jnp.dot(out_h.astype(jnp.bfloat16), wo_ref[0],
                            preferred_element_type=jnp.float32)      # (N, C)

    @pl.when(h == pl.num_programs(1) - 1)
    def _finalize():
        o_ref[0] = (acc_ref[...] + bproj_ref[0]).astype(o_ref.dtype)


def prepare_attention_params(w_qkv, w_proj, b_proj, *, num_heads: int):
    """One-time (outside the hot path) weight re-layout.

    w_qkv : (3C, C)  PyTorch nn.Linear(dim, 3*dim).weight
    w_proj: (C, C)   PyTorch nn.Linear(dim, dim).weight
    b_proj: (C,)     PyTorch nn.Linear(dim, dim).bias
    Returns per-head, bf16, scale-folded weight blocks.
    """
    three_c, C = w_qkv.shape
    assert three_c == 3 * C and C % num_heads == 0
    hd = C // num_heads
    scale = hd ** -0.5

    # qkv output features are ordered (qkv_idx, head, hd) -> split per head.
    w = w_qkv.reshape(3, num_heads, hd, C)                    # (3, H, hd, C)
    wq = jnp.transpose(w[0], (0, 2, 1)) * scale               # (H, C, hd)
    wk = jnp.transpose(w[1], (0, 2, 1))                       # (H, C, hd)
    wv = jnp.transpose(w[2], (0, 2, 1))                       # (H, C, hd)
    # y = out @ w_proj.T ; rows of w_proj.T are ordered (head, hd).
    wo = jnp.transpose(w_proj).reshape(num_heads, hd, C)      # (H, hd, C)

    return (wq.astype(jnp.bfloat16), wk.astype(jnp.bfloat16),
            wv.astype(jnp.bfloat16), wo.astype(jnp.bfloat16),
            b_proj.reshape(1, C).astype(jnp.float32))


def attention_pallas(x, wq, wk, wv, wo, b_proj_2d, *, num_heads: int):
    """x: (B, N, C); wq/wk/wv: (H, C, hd); wo: (H, hd, C); b_proj_2d: (1, C)."""
    B, N, C = x.shape
    hd = C // num_heads
    x_bf16 = x.astype(jnp.bfloat16)

    # TODO(synk): for very long sequences (e.g. N>=2048 on v7x) the (N, N)
    # logits tile should additionally be blocked over a q-tile grid axis
    # (flash-style online softmax); not needed at these shapes.
    return pl.pallas_call(
        _attention_kernel,
        out_shape=jax.ShapeDtypeStruct((B, N, C), x.dtype),
        grid_spec=pltpu.PrefetchScalarGridSpec(
            num_scalar_prefetch=0,
            grid=(B, num_heads),
            in_specs=[
                pl.BlockSpec((1, N, C), lambda b, h: (b, 0, 0)),    # x
                pl.BlockSpec((1, C, hd), lambda b, h: (h, 0, 0)),   # wq
                pl.BlockSpec((1, C, hd), lambda b, h: (h, 0, 0)),   # wk
                pl.BlockSpec((1, C, hd), lambda b, h: (h, 0, 0)),   # wv
                pl.BlockSpec((1, hd, C), lambda b, h: (h, 0, 0)),   # wo
                pl.BlockSpec((1, C), lambda b, h: (0, 0)),          # bias
            ],
            out_specs=pl.BlockSpec((1, N, C), lambda b, h: (b, 0, 0)),
            scratch_shapes=[pltpu.VMEM((N, C), jnp.float32)],
        ),
        compiler_params=pltpu.CompilerParams(
            dimension_semantics=("parallel", "arbitrary"),
            vmem_limit_bytes=48 * 1024 * 1024,
        ),
    )(x_bf16, wq, wk, wv, wo, b_proj_2d)


def attention_ref(x, w_qkv, w_proj, b_proj, *, num_heads: int):
    """Pure-JAX f32 reference mirroring the PyTorch forward exactly."""
    B, N, C = x.shape
    hd = C // num_heads
    scale = hd ** -0.5
    qkv = x @ w_qkv.T                                            # (B, N, 3C)
    qkv = qkv.reshape(B, N, 3, num_heads, hd).transpose(2, 0, 3, 1, 4)
    q, k, v = qkv[0], qkv[1], qkv[2]                             # (B, H, N, hd)
    attn = jnp.einsum("bhnd,bhmd->bhnm", q, k) * scale
    attn = jax.nn.softmax(attn, axis=-1)
    out = jnp.einsum("bhnm,bhmd->bhnd", attn, v)
    out = out.transpose(0, 2, 1, 3).reshape(B, N, C)
    return out @ w_proj.T + b_proj


def xavier_uniform(key, shape, dtype=jnp.float32):
    fan_out, fan_in = shape
    limit = (6.0 / (fan_in + fan_out)) ** 0.5
    return jax.random.uniform(key, shape, dtype, minval=-limit, maxval=limit)


if __name__ == "__main__":
    # Module hyperparameters (dim // num_heads must be integral).
    B, N, C = 2, 16, 64
    num_heads = 8

    key = jax.random.PRNGKey(0)
    k_x, k_qkv, k_proj = jax.random.split(key, 3)

    x = jax.random.normal(k_x, (B, N, C), dtype=jnp.float32)

    # Deterministic parameter init matching the module's _init_weights:
    # xavier_uniform weights, zero bias.  qkv_bias=False -> no qkv bias.
    w_qkv = xavier_uniform(k_qkv, (3 * C, C))     # nn.Linear(dim, 3*dim).weight
    w_proj = xavier_uniform(k_proj, (C, C))       # nn.Linear(dim, dim).weight
    b_proj = jnp.zeros((C,), dtype=jnp.float32)   # nn.Linear(dim, dim).bias

    params = prepare_attention_params(w_qkv, w_proj, b_proj, num_heads=num_heads)

    out = attention_pallas(x, *params, num_heads=num_heads)
    out = jax.block_until_ready(out)

    ref = attention_ref(x, w_qkv, w_proj, b_proj, num_heads=num_heads)
    assert out.shape == (B, N, C)
    # bf16 MXU inputs + approx reciprocal -> loosened tolerance vs f32 reference.
    err = float(jnp.max(jnp.abs(out - ref)))
    assert err < 5e-2, f"mismatch vs reference (max abs err {err})"

    print("KERNEL_OK")
</pallas_src>

<mosaic_0001>
module attributes {stable_mosaic.version = 11 : i64} {
  func.func @_attention_kernel(%arg0: i32, %arg1: i32, %arg2: memref<1x16x64xbf16, #tpu.memory_space<vmem>>, %arg3: memref<1x64x8xbf16, #tpu.memory_space<vmem>>, %arg4: memref<1x64x8xbf16, #tpu.memory_space<vmem>>, %arg5: memref<1x64x8xbf16, #tpu.memory_space<vmem>>, %arg6: memref<1x8x64xbf16, #tpu.memory_space<vmem>>, %arg7: memref<1x64xf32, #tpu.memory_space<vmem>>, %arg8: memref<1x16x64xf32, #tpu.memory_space<vmem>>, %arg9: memref<16x64xf32, #tpu.memory_space<vmem>>) attributes {dimension_semantics = [#tpu.dimension_semantics<parallel>, #tpu.dimension_semantics<arbitrary>], iteration_bounds = array<i64: 2, 8>, scalar_prefetch = 0 : i64, scratch_operands = 1 : i64, tpu.core_type = #tpu.core_type<tc>, window_params = [{transform_indices = @transform_0, window_bounds = array<i64: 1, 16, 64>}, {transform_indices = @transform_1, window_bounds = array<i64: 1, 64, 8>}, {transform_indices = @transform_2, window_bounds = array<i64: 1, 64, 8>}, {transform_indices = @transform_3, window_bounds = array<i64: 1, 64, 8>}, {transform_indices = @transform_4, window_bounds = array<i64: 1, 8, 64>}, {pipeline_mode = #tpu.pipeline_mode<synchronous>, transform_indices = @transform_5, window_bounds = array<i64: 1, 64>}, {transform_indices = @transform_6, window_bounds = array<i64: 1, 16, 64>}]} {
    %c0_i32 = arith.constant 0 : i32
    %0 = arith.cmpi eq, %arg1, %c0_i32 : i32
    %1 = arith.extui %0 : i1 to i32
    %c0_i32_0 = arith.constant 0 : i32
    %2 = arith.cmpi ne, %1, %c0_i32_0 : i32
    scf.if %2 {
      %cst_27 = arith.constant 0.000000e+00 : f32
      %40 = vector.broadcast %cst_27 : f32 to vector<16x64xf32>
      %c0_28 = arith.constant 0 : index
      %c0_29 = arith.constant 0 : index
      %41 = vector.load %arg9[%c0_28, %c0_29] : memref<16x64xf32, #tpu.memory_space<vmem>>, vector<16x64xf32>
      tpu.vector_store %arg9[%c0_28, %c0_29], %40 {strides = array<i32>} : memref<16x64xf32, #tpu.memory_space<vmem>>, vector<16x64xf32>,
    } else {
    }
    %c0 = arith.constant 0 : index
    %c0_1 = arith.constant 0 : index
    %c0_2 = arith.constant 0 : index
    %3 = vector.load %arg2[%c0, %c0_1, %c0_2] : memref<1x16x64xbf16, #tpu.memory_space<vmem>>, vector<1x16x64xbf16>
    %4 = vector.shape_cast %3 : vector<1x16x64xbf16> to vector<16x64xbf16>
    %c0_3 = arith.constant 0 : index
    %c0_4 = arith.constant 0 : index
    %c0_5 = arith.constant 0 : index
    %5 = vector.load %arg3[%c0_3, %c0_4, %c0_5] : memref<1x64x8xbf16, #tpu.memory_space<vmem>>, vector<1x64x8xbf16>
    %6 = vector.shape_cast %5 : vector<1x64x8xbf16> to vector<64x8xbf16>
    %cst = arith.constant dense<0.000000e+00> : vector<16x8xf32>
    %7 = tpu.matmul %4, %6, %cst {dimension_numbers = #tpu.dot_dimension_numbers<[1], [0], [0], [1], [0, 0, 1, 1], [], []>} : vector<16x64xbf16>, vector<64x8xbf16>, vector<16x8xf32> -> vector<16x8xf32>
    %c0_6 = arith.constant 0 : index
    %c0_7 = arith.constant 0 : index
    %c0_8 = arith.constant 0 : index
    %8 = vector.load %arg4[%c0_6, %c0_7, %c0_8] : memref<1x64x8xbf16, #tpu.memory_space<vmem>>, vector<1x64x8xbf16>
    %9 = vector.shape_cast %8 : vector<1x64x8xbf16> to vector<64x8xbf16>
    %cst_9 = arith.constant dense<0.000000e+00> : vector<16x8xf32>
    %10 = tpu.matmul %4, %9, %cst_9 {dimension_numbers = #tpu.dot_dimension_numbers<[1], [0], [0], [1], [0, 0, 1, 1], [], []>} : vector<16x64xbf16>, vector<64x8xbf16>, vector<16x8xf32> -> vector<16x8xf32>
    %c0_10 = arith.constant 0 : index
    %c0_11 = arith.constant 0 : index
    %c0_12 = arith.constant 0 : index
    %11 = vector.load %arg5[%c0_10, %c0_11, %c0_12] : memref<1x64x8xbf16, #tpu.memory_space<vmem>>, vector<1x64x8xbf16>
    %12 = vector.shape_cast %11 : vector<1x64x8xbf16> to vector<64x8xbf16>
    %cst_13 = arith.constant dense<0.000000e+00> : vector<16x8xf32>
    %13 = tpu.matmul %4, %12, %cst_13 {dimension_numbers = #tpu.dot_dimension_numbers<[1], [0], [0], [1], [0, 0, 1, 1], [], []>} : vector<16x64xbf16>, vector<64x8xbf16>, vector<16x8xf32> -> vector<16x8xf32>
    %14 = arith.truncf %7 : vector<16x8xf32> to vector<16x8xbf16>
    %15 = arith.truncf %10 : vector<16x8xf32> to vector<16x8xbf16>
    %cst_14 = arith.constant dense<0.000000e+00> : vector<16x16xf32>
    %16 = tpu.matmul %14, %15, %cst_14 {dimension_numbers = #tpu.dot_dimension_numbers<[1], [1], [0], [0], [0, 0, 1, 0], [], []>} : vector<16x8xbf16>, vector<16x8xbf16>, vector<16x16xf32> -> vector<16x16xf32>
    %cst_15 = arith.constant dense<0xFF800000> : vector<16xf32>
    %17 = vector.multi_reduction <maximumf>, %16, %cst_15 [1] : vector<16x16xf32> to vector<16xf32>
    %18 = vector.shape_cast %17 : vector<16xf32> to vector<16x1xf32>
    %19 = vector.broadcast %18 : vector<16x1xf32> to vector<16x16xf32>
    %20 = arith.subf %16, %19 : vector<16x16xf32>
    %21 = math.exp %20 : vector<16x16xf32>
    %cst_16 = arith.constant dense<0.000000e+00> : vector<16xf32>
    %22 = vector.multi_reduction <add>, %21, %cst_16 [1] : vector<16x16xf32> to vector<16xf32>
    %23 = vector.shape_cast %22 : vector<16xf32> to vector<16x1xf32>
    %24 = tpu.reciprocal %23 {approx = true} : vector<16x1xf32> -> vector<16x1xf32>
    %25 = vector.broadcast %24 : vector<16x1xf32> to vector<16x16xf32>
    %26 = arith.mulf %21, %25 : vector<16x16xf32>
    %27 = arith.truncf %26 : vector<16x16xf32> to vector<16x16xbf16>
    %28 = arith.truncf %13 : vector<16x8xf32> to vector<16x8xbf16>
    %cst_17 = arith.constant dense<0.000000e+00> : vector<16x8xf32>
    %29 = tpu.matmul %27, %28, %cst_17 {dimension_numbers = #tpu.dot_dimension_numbers<[1], [0], [0], [1], [0, 0, 1, 1], [], []>} : vector<16x16xbf16>, vector<16x8xbf16>, vector<16x8xf32> -> vector<16x8xf32>
    %c0_18 = arith.constant 0 : index
    %c0_19 = arith.constant 0 : index
    %30 = vector.load %arg9[%c0_18, %c0_19] : memref<16x64xf32, #tpu.memory_space<vmem>>, vector<16x64xf32>
    %31 = arith.truncf %29 : vector<16x8xf32> to vector<16x8xbf16>
    %c0_20 = arith.constant 0 : index
    %c0_21 = arith.constant 0 : index
    %c0_22 = arith.constant 0 : index
    %32 = vector.load %arg6[%c0_20, %c0_21, %c0_22] : memref<1x8x64xbf16, #tpu.memory_space<vmem>>, vector<1x8x64xbf16>
    %33 = vector.shape_cast %32 : vector<1x8x64xbf16> to vector<8x64xbf16>
    %cst_23 = arith.constant dense<0.000000e+00> : vector<16x64xf32>
    %34 = tpu.matmul %31, %33, %cst_23 {dimension_numbers = #tpu.dot_dimension_numbers<[1], [0], [0], [1], [0, 0, 1, 1], [], []>} : vector<16x8xbf16>, vector<8x64xbf16>, vector<16x64xf32> -> vector<16x64xf32>
    %35 = arith.addf %30, %34 : vector<16x64xf32>
    %c0_24 = arith.constant 0 : index
    %c0_25 = arith.constant 0 : index
    %36 = vector.load %arg9[%c0_24, %c0_25] : memref<16x64xf32, #tpu.memory_space<vmem>>, vector<16x64xf32>
    tpu.vector_store %arg9[%c0_24, %c0_25], %35 {strides = array<i32>} : memref<16x64xf32, #tpu.memory_space<vmem>>, vector<16x64xf32>,
    %c7_i32 = arith.constant 7 : i32
    %37 = arith.cmpi eq, %arg1, %c7_i32 : i32
    %38 = arith.extui %37 : i1 to i32
    %c0_i32_26 = arith.constant 0 : i32
    %39 = arith.cmpi ne, %38, %c0_i32_26 : i32
    scf.if %39 {
      %c0_27 = arith.constant 0 : index
      %c0_28 = arith.constant 0 : index
      %40 = vector.load %arg9[%c0_27, %c0_28] : memref<16x64xf32, #tpu.memory_space<vmem>>, vector<16x64xf32>
      %c0_29 = arith.constant 0 : index
      %c0_30 = arith.constant 0 : index
      %41 = vector.load %arg7[%c0_29, %c0_30] : memref<1x64xf32, #tpu.memory_space<vmem>>, vector<1x64xf32>
      %42 = vector.shape_cast %41 : vector<1x64xf32> to vector<64xf32>
      %43 = vector.shape_cast %42 : vector<64xf32> to vector<1x64xf32>
      %44 = vector.broadcast %43 : vector<1x64xf32> to vector<16x64xf32>
      %45 = arith.addf %40, %44 : vector<16x64xf32>
      %c0_31 = arith.constant 0 : index
      %c0_32 = arith.constant 0 : index
      %c0_33 = arith.constant 0 : index
      %46 = vector.load %arg8[%c0_31, %c0_32, %c0_33] : memref<1x16x64xf32, #tpu.memory_space<vmem>>, vector<1x16x64xf32>
      %47 = vector.shape_cast %46 : vector<1x16x64xf32> to vector<16x64xf32>
      %48 = vector.shape_cast %45 : vector<16x64xf32> to vector<1x16x64xf32>
      tpu.vector_store %arg8[%c0_31, %c0_32, %c0_33], %48 {strides = array<i32>} : memref<1x16x64xf32, #tpu.memory_space<vmem>>, vector<1x16x64xf32>,
    } else {
    }
    return
  }
  func.func @transform_0(%arg0: i32, %arg1: i32) -> (i32, i32, i32) {
    %c0_i32 = arith.constant 0 : i32
    %c0_i32_0 = arith.constant 0 : i32
    %c0_i32_1 = arith.constant 0 : i32
    return %arg0, %c0_i32, %c0_i32_0 : i32, i32, i32
  }
  func.func @transform_1(%arg0: i32, %arg1: i32) -> (i32, i32, i32) {
    %c0_i32 = arith.constant 0 : i32
    %c0_i32_0 = arith.constant 0 : i32
    %c0_i32_1 = arith.constant 0 : i32
    return %arg1, %c0_i32, %c0_i32_0 : i32, i32, i32
  }
  func.func @transform_2(%arg0: i32, %arg1: i32) -> (i32, i32, i32) {
    %c0_i32 = arith.constant 0 : i32
    %c0_i32_0 = arith.constant 0 : i32
    %c0_i32_1 = arith.constant 0 : i32
    return %arg1, %c0_i32, %c0_i32_0 : i32, i32, i32
  }
  func.func @transform_3(%arg0: i32, %arg1: i32) -> (i32, i32, i32) {
    %c0_i32 = arith.constant 0 : i32
    %c0_i32_0 = arith.constant 0 : i32
    %c0_i32_1 = arith.constant 0 : i32
    return %arg1, %c0_i32, %c0_i32_0 : i32, i32, i32
  }
  func.func @transform_4(%arg0: i32, %arg1: i32) -> (i32, i32, i32) {
    %c0_i32 = arith.constant 0 : i32
    %c0_i32_0 = arith.constant 0 : i32
    %c0_i32_1 = arith.constant 0 : i32
    return %arg1, %c0_i32, %c0_i32_0 : i32, i32, i32
  }
  func.func @transform_5(%arg0: i32, %arg1: i32) -> (i32, i32) {
    %c0_i32 = arith.constant 0 : i32
    %c0_i32_0 = arith.constant 0 : i32
    %c0_i32_1 = arith.constant 0 : i32
    return %c0_i32, %c0_i32_0 : i32, i32
  }
  func.func @transform_6(%arg0: i32, %arg1: i32) -> (i32, i32, i32) {
    %c0_i32 = arith.constant 0 : i32
    %c0_i32_0 = arith.constant 0 : i32
    %c0_i32_1 = arith.constant 0 : i32
    return %arg0, %c0_i32, %c0_i32_0 : i32, i32, i32
  }
}

</mosaic_0001>

<bundles_post_ra>
// kernel: tpu_custom_call.1
= control target key start
LH: loop header
LB: loop body
LE: loop exit
PB: predicated region body
PF: predicated region fallthrough
CT: control target
= control target key end

     0   :  { %11 = vsyncpa [#allocation4], 0  ;;  %s1483_s0 = inlined_call_operand.vmem [shape: bf16[2,16,64], index: 0, kind: input, shape index: {}]   ;;  %s1484_s1 = inlined_call_operand.vmem [shape: bf16[8,64,8], index: 1, kind: input, shape index: {}]   ;;  %s1485_s2 = inlined_call_operand.vmem [shape: bf16[8,64,8], index: 2, kind: input, shape index: {}]   ;;  %s1486_s3 = inlined_call_operand.vmem [shape: bf16[8,64,8], index: 3, kind: input, shape index: {}]   ;;  %s1487_s4 = inlined_call_operand.vmem [shape: bf16[8,8,64], index: 4, kind: input, shape index: {}]   ;;  %s1488_s5 = inlined_call_operand.vmem [shape: f32[1,64], index: 5, kind: input, shape index: {}]   ;;  %s1489_s6 = inlined_call_operand.hbm [shape: f32[2,16,64], index: 6, kind: output, shape index: {}]  }
   0x1   :  { %13 = vsyncpa [#allocation4 + $0x1], 0  ;;  %s1260_s21 = smov 0   ;;  %s1262_s22 = smov 0  }
   0x2   :  { %s1264_s23 = smov 0   ;;  %s1266_s24 = smov 0  }
   0x3   :  { %s1268_s25 = smov 0   ;;  %s1270_s26 = smov 0  }
   0x4   :  { %s1272_s27 = smov 0   ;;  %s1274_s28 = smov 0  }
   0x5 LB: > { %1496 = sst [smem:[#allocation6_spill]] %s1197_s23  ;;  %s904_s29 = sadd.s32 4294967295, %s1217_s28   ;;  %s1217_s28 = sphi %s1274_s28, %s19_s28   ;;  %s1213_s27 = sphi %s1272_s27, %s1512_s27   ;;  %s1209_s26 = sphi %s1270_s26, %s1511_s26   ;;  %s1205_s25 = sphi %s1268_s25, %s1510_s25   ;;  %s1201_s24 = sphi %s1266_s24, %s1509_s24   ;;  %s1197_s23 = sphi %s1264_s23, %s1508_s23   ;;  %s1193_s22 = sphi %s1262_s22, %s1514_s22   ;;  %s1189_s21 = sphi %s1260_s21, %s1513_s21  }
   0x6   : > { %1497 = sst [smem:[#allocation7_spill]] %s1209_s26  ;;  %s905_s30 = sadd.s32 4294967294, %s1217_s28  }
   0x7   : > { %1498 = sst [smem:[#allocation8_spill]] %s1213_s27  ;;  %s28_s7 = sadd.s32 1, %s1209_s26 }
   0x8   : > { %p29_p0 = scmp.ge.s32.totalorder %s28_s7, 8  ;;  %s31_s8 = sadd.s32 1, %s1213_s27 }
   0x9   : > { %p199_p1 = scmp.ne.s32.totalorder %s1197_s23, %s1193_s22  ;;  %p200_p2 = scmp.eq.s32.totalorder %s904_s29, 15 }
   0xa   : > { %s1516_s7 = smov (%p29_p0, %s28_s7), 0  ;;  %s1518_s8 = smov (!%p29_p0, %s31_s8), %s1213_s27 }
   0xb   : > { %1499 = sst [smem:[#allocation9_spill]] %s1516_s7  ;;  %p1309_p3 = por %p200_p2, %p199_p1 }
   0xc   : > { %p205_p4 = scmp.ne.s32.totalorder %s1193_s22, %s1189_s21  ;;  %p33_p5 = scmp.ge.s32.totalorder %s1518_s8, 2 }
   0xd   : > { %p206_p6 = scmp.eq.s32.totalorder %s905_s30, 15  ;;  %p908_p7 = scmp.ge.s32.totalorder %s1217_s28, 1 }
   0xe   : > { %p266_p8 = scmp.lt.s32.totalorder %s1217_s28, 17  ;;  %s1520_s8 = smov (%p33_p5, %s1518_s8), 0 }
   0xf   : > { %1501 = sst [smem:[#allocation10_spill]] %s1520_s8  ;;  %p1319_p9 = por %p206_p6, %p205_p4 }
  0x10   : > { %p267_p10 = pnand %p908_p7, %p266_p8  ;;  %s186_s11 = ssub.s32 %s1213_s27, %s1520_s8 }
  0x11   : > { %s1502_s10 = scalar_select %p1319_p9, 1, 0 }
  0x12   : > { %s189_s12 = sadd.s32 1, %s1197_s23  ;;  %p187_p11 = scmp.eq.s32.totalorder %s186_s11, 0 }
  0x13   : > { %1503 = sst [smem:[#allocation11_spill]] %s1502_s10  ;;  %270 = sbr.rel (%p267_p10) target bundleno = 1277 (0x4fd), region = 44 }
  0x14   : > { %s1327_s13 = scalar_select %p187_p11, %s1197_s23, %s189_s12  }
  0x15   : > { %s1493_s14 = sand.u32 (!%p267_p10), 1, %s1193_s22   ;;  %p315_p12 = scmp.lt.s32.totalorder (!%p267_p10), %s1205_s25, 1 }
  0x16   : > { %1504 = sst [smem:[#allocation12_spill]] %s1327_s13  ;;  %s909_s15 = sshll.u32 (!%p267_p10), %s1493_s14, 4 }
  0x17   : > { %p320_p13 = scmp.lt.s32.totalorder (!%p267_p10), %s1201_s24, 7  ;;  %s1359_s20 = scalar_lea.vmem (!%p267_p10), [#allocation3], %s909_s15 }
  0x18   : > { %p919_p0 = scmp.ne.s32.totalorder (!%p267_p10), %s1201_s24, 0 }
  0x1a   : > { %s316_s16 = scalar_select %p315_p12, %s1205_s25, 1 }
  0x1b   : > { %s321_s17 = scalar_select %p320_p13, %s1201_s24, 7 }
  0x1c   : > { %s946_s18 = sshll.u32 %s316_s16, 3  ;;  %343 = sbr.rel (%p919_p0) target bundleno = 35 (0x23), region = 48  ;;  %vm344_vm0 = vcmask (!%p919_p0), 523264   ;;  %v1219_v0 = vmov (!%p919_p0), 0.0  }
  0x1d   : > { %s1339_s29 = scalar_lea.vmem %s1483_s0, %s946_s18  ;;  %s947_s30 = sshll.u32 %s321_s17, 5  ;;  %345 = vst.msk [vmem:[#allocation2] sm:$0xff] (!%p919_p0), %vm344_vm0, %v1219_v0  ;;  %346 = vst.msk [vmem:[#allocation2 + $0x8] sm:$0xff] (!%p919_p0), %vm344_vm0, %v1219_v0 }
  0x1e   : > { %s1344_s8 = scalar_lea.vmem %s1484_s1, %s947_s30  ;;  %s329_s26 = scalar_lea.vmem %s1485_s2, %s947_s30 }
  0x1f   : > { %s1352_s23 = scalar_lea.vmem %s1486_s3, %s947_s30  ;;  %s918_s16 = sshll.u32 %s321_s17, 2 }
  0x20   : > { %s1357_s18 = scalar_lea.vmem %s1487_s4, %s918_s16 }
  0x23 PF: > { %v1102_v1 = vld [vmem:[%s329_s26] sm:$0xff]   ;;  %v1220_v2 = vmov 0.0   ;;  %v1103_v3 = vld [vmem:[%s329_s26 + $0x8] sm:$0xff]   ;;  %vm1221_vm1 = vmmov 0   ;;  %v1105_v6 = vld [vmem:[%s329_s26 + $0x10] sm:$0xff]   ;;  %vm386_vm2 = vcmask 523264  }
  0x24   : > { %984 = vmatprep.subr.bf16.mxu1 %v1220_v2  ;;  %972 = vmatprep.subr.bf16.mxu0 %v1220_v2  ;;  %v1104_v4 = vld [vmem:[%s1344_s8] sm:$0xff]   ;;  %v1106_v5 = vld [vmem:[%s1344_s8 + $0x8] sm:$0xff]   ;;  %v1107_v7 = vld [vmem:[%s329_s26 + $0x18] sm:$0xff]   ;;  %vm579_vm3 = vcmask 64512   ;;  %vm627_vm4 = vcmask 130048   ;;  %vm703_vm5 = vcmask 1043456  }
  0x25   : > { %985 = vmatpush3.bf16.msra.mxu1 %v1102_v1  ;;  %992 = vmatprep.mubr.msk.bf16.mxu1 %vm1221_vm1, %v1220_v2  ;;  %v1108_v8 = vld [vmem:[%s1344_s8 + $0x10] sm:$0xff]   ;;  %v1110_v9 = vld [vmem:[%s1344_s8 + $0x18] sm:$0xff]   ;;  %v1109_v10 = vld [vmem:[%s1339_s29] sm:$0xff]   ;;  %p939_p1 = scmp.ne.s32.totalorder %s1201_s24, 7 }
  0x26   : > { %986 = vmatprep.subr.bf16.mxu1 %v1220_v2  ;;  %980 = vmatprep.mubr.msk.bf16.mxu0 %vm1221_vm1, %v1220_v2  ;;  %v1111_v22 = vld [vmem:[%s1352_s23] sm:$0xff]   ;;  %v1112_v23 = vld [vmem:[%s1352_s23 + $0x8] sm:$0xff]   ;;  %v1113_v24 = vld [vmem:[%s1352_s23 + $0x10] sm:$0xff]  }
  0x27   : > { %973 = vmatpush3.bf16.msra.mxu0 %v1104_v4  ;;  %v1114_v25 = vld [vmem:[%s1352_s23 + $0x18] sm:$0xff]   ;;  %v699_v47 = vld [vmem:[%s1357_s18] sm:$0xf]  ;;  %v697_v63 = vld [vmem:[#allocation2 + $0x8] sm:$0xff] }
  0x28   : > { %974 = vmatprep.subr.bf16.mxu0 %v1220_v2  ;;  %v705_v48 = vsel %vm703_vm5, %v699_v47, 0  ;;  %v696_v61 = vld [vmem:[#allocation2] sm:$0xff] }
  0x29   : > { %987 = vmatpush3.bf16.msra.mxu1 %v1103_v3 }
  0x2a   : > { %988 = vmatprep.subr.bf16.mxu1 %v1220_v2 }
  0x2b   : > { %975 = vmatpush3.bf16.msra.mxu0 %v1106_v5 }
  0x2c   : > { %976 = vmatprep.subr.bf16.mxu0 %v1220_v2 }
  0x2d   : > { %989 = vmatpush3.bf16.msra.mxu1 %v1105_v6  ;;  %v940_v6 = vld [vmem:[%s1488_s5] ss:$0 sm:$0xff] (!%p939_p1) }
  0x2e   : > { %990 = vmatprep.subr.bf16.mxu1 %v1220_v2 }
  0x2f   : > { %977 = vmatpush3.bf16.msra.mxu0 %v1108_v8 }
  0x30   : > { %978 = vmatprep.subr.bf16.mxu0 %v1220_v2 }
  0x31   : > { %991 = vmatpush3.bf16.msra.mxu1 %v1107_v7 }
  0x32   : > { %1008 = vmatprep.subr.bf16.mxu1 %v1220_v2 }
  0x33   : > { %979 = vmatpush3.bf16.msra.mxu0 %v1110_v9 }
  0x34   : > { %993 = vmatmul.mubr.msk.bf16.vlgmr.msra.gmra.mrb[0].mxu1 %vm386_vm2, %v1109_v10  ;;  %996 = vmatprep.subr.bf16.mxu0 %v1220_v2 }
  0x35   : > { %1010 = vmatprep.mubr.msk.bf16.mxu1 %vm1221_vm1, %v1220_v2 }
  0x36   : > { %981 = vmatmul.mubr.msk.bf16.vlgmr.msra.gmra.mrb[0].mxu0 %vm386_vm2, %v1109_v10 }
  0x37   : > { %1004 = vmatprep.mubr.msk.bf16.mxu0 %vm1221_vm1, %v1220_v2  ;;  %997 = vmatpush3.bf16.msra.mxu0 %v1111_v22 }
  0x38   : > { %998 = vmatprep.subr.bf16.mxu0 %v1220_v2 }
  0x3b   : > { %999 = vmatpush3.bf16.msra.mxu0 %v1112_v23 }
  0x3c   : > { %1000 = vmatprep.subr.bf16.mxu0 %v1220_v2 }
  0x3f   : > { %1001 = vmatpush3.bf16.msra.mxu0 %v1113_v24 }
  0x40   : > { %1002 = vmatprep.subr.bf16.mxu0 %v1220_v2 }
  0x43   : > { %1003 = vmatpush3.bf16.msra.mxu0 %v1114_v25 }
  0x44   : > { %1020 = vmatprep.subr.bf16.mxu0 %v1220_v2 }
  0x46   : > { %1005 = vmatmul.mubr.msk.bf16.vlgmr.msra.gmra.mrb[4].mxu0 %vm386_vm2, %v1109_v10 }
  0x47   : > { %1022 = vmatprep.mubr.msk.bf16.mxu0 %vm1221_vm1, %v1220_v2  ;;  %1021 = vmatpush3.bf16.msra.mxu0 %v705_v48 }
 0x107   : > { %v497_v11 = vpop.f32.mrb[0].mxu1 }
 0x108   : > { %v994_v12 = vpop.f32.mrb[1].mxu1 }
 0x109   : > { %v500_v13 = vpop.f32.mrb[2].mxu1  ;;  %v424_v14 = vpop.f32.mrb[0].mxu0 }
 0x10a   : > { %v578_v15 = vpack.c.bf16 %v500_v13, %v497_v11  ;;  %v995_v16 = vpop.f32.mrb[3].mxu1  ;;  %v982_v17 = vpop.f32.mrb[1].mxu0 }
 0x10b   : > { %v427_v18 = vpop.f32.mrb[2].mxu0 }
 0x10c   : > { %v584_v19 = vsel %vm579_vm3, %v578_v15, 0  ;;  %v577_v20 = vpack.c.bf16 %v427_v18, %v424_v14  ;;  %v983_v21 = vpop.f32.mrb[3].mxu0 }
 0x10d   : > { %1009 = vmatpush3.bf16.xpose.msra.mxu1 %v584_v19 }
 0x10e   : > { %1014 = vmatprep.subr.bf16.mxu1 %v1220_v2 }
 0x114   : > { %1011 = vmatmul.mubr.msk.bf16.vlgmr.msra.gmra.mrb[4].mxu1 %vm579_vm3, %v577_v20 }
 0x115   : > { %1016 = vmatprep.mubr.msk.bf16.mxu1 %vm1221_vm1, %v1220_v2 }
 0x119   : > { %v570_v42 = vpop.f32.mrb[4].mxu0 }
 0x11a   : > { %v1006_v43 = vpop.f32.mrb[5].mxu0 }
 0x11b   : > { %v573_v44 = vpop.f32.mrb[6].mxu0 }
 0x11c   : > { %v1007_v45 = vpop.f32.mrb[7].mxu0  ;;  %v651_v46 = vpack.c.bf16 %v573_v44, %v570_v42 }
 0x11e   : > { %1015 = vmatpush3.bf16.msra.mxu1 %v651_v46 }
 0x1e7   : > { %v620_v26 = vpop.f32.mrb[4].mxu1 }
 0x1e8   : > { %v1012_v27 = vpop.f32.mrb[5].mxu1  ;;  %v628_v28 = vsel %vm627_vm4, %v620_v26, -inf }
 0x1e9   : > { %629 = vmax.xlane.f32.xlu0 %v628_v28  ;;  %v623_v29 = vpop.f32.mrb[6].mxu1 }
 0x1ea   : > { %v1013_v30 = vpop.f32.mrb[7].mxu1  ;;  %v631_v31 = vsel %vm627_vm4, %v623_v29, -inf }
 0x1ed   : > { %632 = vmax.xlane.f32.xlu0 %v631_v31 }
 0x276   : > { %v630_v32 = vpop.xlane.xlu0 %629 }
 0x277   : > { %v634_v33 = vsub.f32 %v620_v26, %v630_v32 }
 0x279   : > { %v636_v34 = vmul.f32 1.442695, %v634_v33 }
 0x27a   : > { %v633_v35 = vpop.xlane.xlu0 %632 }
 0x27b   : > { %1115 = vpow2.f32 %v636_v34  ;;  %v635_v36 = vsub.f32 %v623_v29, %v633_v35 }
 0x27d   : > { %v638_v37 = vmul.f32 1.442695, %v635_v36 }
 0x27f   : > { %1117 = vpow2.f32 %v638_v37 }
 0x285   : > { %v1116_v38 = vpop.eup %1115 }
 0x286   : > { %v640_v39 = vsel %vm627_vm4, %v1116_v38, 0.0 }
 0x287   : > { %641 = vadd.xlane.f32.xlu1 %v640_v39 }
 0x289   : > { %v1118_v40 = vpop.eup %1117 }
 0x28a   : > { %v643_v41 = vsel %vm627_vm4, %v1118_v40, 0.0 }
 0x28b   : > { %644 = vadd.xlane.f32.xlu1 %v643_v41 }
 0x314   : > { %v642_v49 = vpop.xlane.xlu1 %641 }
 0x315   : > { %1119 = vrcp.f32 %v642_v49 }
 0x318   : > { %v645_v50 = vpop.xlane.xlu1 %644 }
 0x319   : > { %1121 = vrcp.f32 %v645_v50 }
 0x31f   : > { %v1120_v51 = vpop.eup %1119 }
 0x320   : > { %v648_v53 = vmul.f32 %v1120_v51, %v1116_v38 }
 0x323   : > { %v1122_v52 = vpop.eup %1121 }
 0x324   : > { %v649_v54 = vmul.f32 %v1122_v52, %v1118_v40 }
 0x326   : > { %v650_v55 = vpack.c.bf16 %v649_v54, %v648_v53 }
 0x328   : > { %1017 = vmatmul.mubr.msk.bf16.vlgmr.msra.gmra.mrb[8].mxu1 %vm627_vm4, %v650_v55 }
 0x3fb   : > { %v689_v56 = vpop.f32.mrb[8].mxu1 }
 0x3fc   : > { %v1018_v57 = vpop.f32.mrb[9].mxu1 }
 0x3fd   : > { %v692_v58 = vpop.f32.mrb[10].mxu1 }
 0x3fe   : > { %v698_v59 = vpack.c.bf16 %v692_v58, %v689_v56  ;;  %v1019_v60 = vpop.f32.mrb[11].mxu1 }
 0x400   : > { %1023 = vmatmul.mubr.msk.bf16.vlgmr.msra.gmra.mrb[8].mxu0 %vm579_vm3, %v698_v59 }
 0x4d2   : > { %755 = sbr.rel (%p939_p1) target bundleno = 1251 (0x4e3), region = 52 }
 0x4d3   : > { %v741_v62 = vpop.f32.mrb[8].mxu0 }
 0x4d4   : > { %v748_v0 = vadd.f32 %v741_v62, %v696_v61  ;;  %v1024_v1 = vpop.f32.mrb[9].mxu0 }
 0x4d5   : > { %v744_v2 = vpop.f32.mrb[10].mxu0 }
 0x4d6   : > { %750 = vst.msk [vmem:[#allocation2] sm:$0xff] %vm386_vm2, %v748_v0  ;;  %v749_v3 = vadd.f32 %v744_v2, %v697_v63  ;;  %v1025_v4 = vpop.f32.mrb[11].mxu0 }
 0x4d8   : > { %751 = vst.msk [vmem:[#allocation2 + $0x8] sm:$0xff] %vm386_vm2, %v749_v3 }
 0x4dd   : > { %v756_v5 = vld [vmem:[#allocation2] sm:$0xff] }
 0x4de   : > { %v765_v8 = vadd.f32 %v940_v6, %v756_v5 }
 0x4df   : > { %v757_v7 = vld [vmem:[#allocation2 + $0x8] sm:$0xff] }
 0x4e0   : > { %v766_v9 = vadd.f32 %v940_v6, %v757_v7  ;;  %767 = vst.msk [vmem:[%s1359_s20] sm:$0xff] %vm386_vm2, %v765_v8 }
 0x4e2   : > { %768 = vst.msk [vmem:[%s1359_s20 + $0x8] sm:$0xff] %vm386_vm2, %v766_v9 }
 0x4e3 PF: > { %s950_s24 = sshll.u32 %s1205_s25, 8  ;;  %s783_s10 = sshll.u32 %s1359_s20, 4  ;;  %s1427_s10 = int_to_ptr.vmem [resolvable:$true] %s783_s10 }
 0x4e4   : > { %s1424_s8 = scalar_lea.hbm %s1489_s6, %s950_s24  ;;  %s1505_s13 = sand.u32 1, %s1193_s22  }
 0x4e5   : > { %s1431_s14 = scalar_lea.sflag [#allocation4], %s1505_s13  ;;  %s1123_s15 = scalar_lea.vmem %s1427_s10, 256 }
 0x4e6   : > { %p1124_p2 = scmp.ne.s32.totalorder %s1427_s10, %s1123_s15  ;;  %s1222_s25 = smov [#allocation3]  }
 0x4e7   : > { %s1127_s17 = sshll.u32 %s1222_s25, 4  ;;  %s1128_s17 = int_to_ptr.vmem [resolvable:$false] %s1127_s17 }
 0x4e8   : > { %p1125_p4 = pnand %p1124_p2, %p1309_p3  ;;  %s1129_s29 = scalar_lea.vmem %s1128_s17, 512 }
 0x4e9   : > { %p1130_p6 = scmp.lt.s32.totalorder %s1427_s10, %s1128_s17  ;;  %p1131_p7 = scmp.lt.s32.totalorder %s1129_s29, %s1123_s15 }
 0x4ea   : > { %p1126_p5 = pneg %p1125_p4 }
 0x4eb   : > { %p1132_p8 = por %p1131_p7, %p1130_p6 }
 0x4ed   : > { %p1133_p10 = pnand %p1132_p8, %p1126_p5 }
 0x4ef   : > { %1136 = shalt.err (!%p1133_p10)
}
 0x4f0   : > { %s1137_s30 = scalar_lea.hbm %s1424_s8, 256  ;;  %s1141_s16 = scalar_lea.hbm %s1489_s6, 512 }
 0x4f1   : > { %p1138_p11 = scmp.ne.s32.totalorder %s1424_s8, %s1137_s30  ;;  %p1142_p0 = scmp.lt.u32.totalorder %s1424_s8, %s1489_s6 }
 0x4f2   : > { %p1143_p1 = scmp.lt.u32.totalorder %s1141_s16, %s1137_s30  ;;  %p1145_p4 = scmp.lt.u32.totalorder %s1137_s30, %s1424_s8 }
 0x4f3   : > { %p1139_p12 = pnand %p1138_p11, %p1309_p3 }
 0x4f4   : > { %p1144_p2 = por %p1143_p1, %p1142_p0 }
 0x4f5   : > { %p1140_p13 = pneg %p1139_p12 }
 0x4f6   : > { %p1146_p5 = por %p1145_p4, %p1144_p2 }
 0x4f8   : > { %p1147_p6 = pnand %p1146_p5, %p1140_p13 }
 0x4fa   : > { %1150 = shalt.err (!%p1147_p6)
}
 0x4fb   : > { %s1223_s20 = smov 128   ;;  %s1224_s23 = smov 8  }
 0x4fc   : > { %1026 = dma.vmem_to_hbm [thread:$0]  (%p1309_p3), %s1427_s10, 256, %s1424_s8, %s1431_s14, %s1223_s20, %s1223_s20, %s1224_s23  }
 0x4fd PF: > { %p1032_p7 = scmp.ge.s32.totalorder %s1217_s28, 2  ;;  %s798_s24 = sand.u32 1, %s1189_s21  }
 0x4fe   : > { %s799_s27 = scalar_lea.sflag [#allocation4], %s798_s24 }
 0x4ff   : > { %p1029_p8 = pnand %p1032_p7, %p1319_p9 }
 0x501   : > { %1184 = dma.done.wait (!%p1029_p8), %s799_s27, 256  }
 0x502   : > { %1186 = vsyncadd (!%p1029_p8), %s799_s27, 4294967040  ;;  %s19_s28 = sadd.s32 1, %s1217_s28   ;;  %s1507_s7 = sld [smem:[#allocation6_spill]] }
 0x503   : > { %p16_p10 = scmp.ge.s32.totalorder %s19_s28, 18   ;;  %s1508_s23 = sld [smem:[#allocation12_spill]] }
 0x504   : > { %s1509_s24 = sld [smem:[#allocation7_spill]]  ;;  %s1510_s25 = sld [smem:[#allocation8_spill]] }
 0x505   : > { %s1511_s26 = sld [smem:[#allocation9_spill]]  ;;  %s1512_s27 = sld [smem:[#allocation10_spill]] }
 0x506   : > { %s1513_s21 = smov %s1193_s22  ;;  %18 = sbr.rel (!%p16_p10) target bundleno = 5 (0x5), region = 99 }
 0x508   : > { %s1514_s22 = smov %s1507_s7 }
 0x50d   :  { %804 = vsyncpa [#allocation4], 1 }
 0x50e   :  { %806 = vsyncpa [#allocation4 + $0x1], 1 }

</bundles_post_ra>
